<compile_context>
chip_gen: v7x
topology: tpu7x:2x2x1
jax: 0.10.0
libtpu: 0.0.40
codegen_flags: <defaults>
</compile_context>

<pallas_src>
import functools

import jax
import jax.numpy as jnp
from jax import lax
from jax.experimental import pallas as pl
from jax.experimental.pallas import tpu as pltpu


def _make_mlp_kernel(num_layers):
    """Kernel refs = (x, w0, b0, w1, b1, ..., out).

    x block: (TB, in_dim) f32 (batch-major, as supplied by the caller).
    w_i: (out_i, in_i) f32 (nn.Linear layout), b_i: (out_i, 1) f32.
    Compute is features-major: h has shape (width, TB) with batch on lanes.
    tanh on every layer except the last, matching MLPCritic.forward."""

    def kernel(*refs):
        x_ref = refs[0]
        out_ref = refs[-1]
        p = refs[1:-1]

        x = x_ref[...]                                   # (TB, in_dim) f32
        w0 = p[0][...]                                   # (h0, in_dim)
        b0 = p[1][...]                                   # (h0, 1)
        # Contract both minor dims: (h0, in) x (TB, in) -> (h0, TB).
        # This puts the batch on the 128-lane axis from the first layer on.
        h = lax.dot_general(w0, x, (((1,), (1,)), ((), ())),
                            preferred_element_type=jnp.float32)
        h = h + b0
        for i in range(1, num_layers):
            h = jnp.tanh(h)                              # hidden activation
            w = p[2 * i][...]                            # (out_i, in_i)
            b = p[2 * i + 1][...]                        # (out_i, 1)
            h = jnp.dot(w, h, preferred_element_type=jnp.float32) + b
        out_ref[...] = h.astype(out_ref.dtype)           # (out_dim, TB), lane-dense

    return kernel


def init_mlp_critic_params(key, num_layers, input_dim, hidden_dim, output_dim):
    """PyTorch-style init; weights (out, in), biases (out, 1), all f32."""
    if num_layers < 1:
        raise ValueError("number of layers should be positive!")
    if num_layers == 1:
        dims = [(input_dim, output_dim)]
    else:
        dims = [(input_dim, hidden_dim)]
        dims += [(hidden_dim, hidden_dim)] * (num_layers - 2)
        dims += [(hidden_dim, output_dim)]

    params = []
    for fan_in, fan_out in dims:
        key, kw, kb = jax.random.split(key, 3)
        bound = 1.0 / (fan_in ** 0.5)                    # nn.Linear default init
        w = jax.random.uniform(kw, (fan_out, fan_in), jnp.float32, -bound, bound)
        b = jax.random.uniform(kb, (fan_out, 1), jnp.float32, -bound, bound)
        params += [w, b]
    return params


def _choose_batch_tile(batch, tile_batch):
    """Lane-aligned batch tile; >=2 grid steps when batch > 128 (v7x TCs)."""
    lane = 128
    if batch <= lane:
        return batch                                     # single full-array block
    half_lane_groups = pl.cdiv(batch, 2 * lane)
    tb = min(tile_batch, lane * half_lane_groups)
    return max(lane, (tb // lane) * lane)


@functools.partial(jax.jit, static_argnames=("tile_batch",))
def mlp_critic_forward(x, params, *, tile_batch=4096):
    batch, input_dim = x.shape
    num_layers = len(params) // 2
    output_dim = params[-1].shape[0]

    tb = _choose_batch_tile(batch, tile_batch)
    num_blocks = pl.cdiv(batch, tb)

    # x streamed batch-major in its native dtype; one (TB, in_dim) block per step.
    x_spec = pl.BlockSpec((tb, input_dim), lambda i: (i, 0))
    # Tiny params: same block for every grid step -> DMA'd once, VMEM-resident.
    param_specs = [pl.BlockSpec(p.shape, lambda i: (0, 0)) for p in params]
    # Lane-dense output: features-major (out_dim, batch), block (out_dim, TB).
    out_spec = pl.BlockSpec((output_dim, tb), lambda i: (0, i))

    layer_dims = [(p.shape[1], p.shape[0]) for p in params[0::2]]
    flops = int(sum(2 * batch * fi * fo for fi, fo in layer_dims))
    transcendentals = int(batch * sum(fo for _, fo in layer_dims[:-1]))
    bytes_accessed = int(
        x.size * x.dtype.itemsize
        + batch * output_dim * 4
        + sum(p.size * p.dtype.itemsize for p in params))

    out_t = pl.pallas_call(
        _make_mlp_kernel(num_layers),
        out_shape=jax.ShapeDtypeStruct((output_dim, batch), jnp.float32),
        grid=(num_blocks,),
        in_specs=[x_spec] + param_specs,
        out_specs=out_spec,
        compiler_params=pltpu.CompilerParams(
            dimension_semantics=("parallel",)),          # 2 TCs on v7x; no-op v5e/v6e
        cost_estimate=pl.CostEstimate(
            flops=flops, transcendentals=transcendentals,
            bytes_accessed=bytes_accessed),
    )(x, *params)
    # Module contract is (batch, output_dim); for output_dim == 1 this transpose
    # is effectively a reshape.  Production call sites can consume the
    # features-major (output_dim, batch) result directly and skip it.
    return out_t.T


def mlp_critic_reference(x, params):
    """Pure-JAX f32 reference matching the PyTorch MLPCritic math."""
    num_layers = len(params) // 2
    h = x
    for i in range(num_layers):
        w = params[2 * i]
        b = params[2 * i + 1]
        h = h @ w.T + b[:, 0]
        if i < num_layers - 1:
            h = jnp.tanh(h)
    return h


if __name__ == "__main__":
    num_layers = 3
    input_dim = 16
    hidden_dim = 32
    output_dim = 1

    key = jax.random.PRNGKey(0)
    params = init_mlp_critic_params(key, num_layers, input_dim, hidden_dim,
                                     output_dim)

    # Case 1: small batch, single full-array block (non-multiples of 8/128 OK).
    key, kx1 = jax.random.split(key)
    x1 = jax.random.normal(kx1, (8, input_dim), jnp.float32)
    out1 = jax.block_until_ready(mlp_critic_forward(x1, params))
    ref1 = mlp_critic_reference(x1, params)
    assert out1.shape == (8, output_dim)
    assert bool(jnp.allclose(out1, ref1, atol=1e-3, rtol=1e-3)), "case1 mismatch"

    # Case 2: multi-step batch grid with a ragged last tile (300 = 2*128 + 44)
    # exercising VMEM-resident params + bounded boundary-block writeback.
    key, kx2 = jax.random.split(key)
    x2 = jax.random.normal(kx2, (300, input_dim), jnp.float32)
    out2 = jax.block_until_ready(
        mlp_critic_forward(x2, params, tile_batch=128))
    ref2 = mlp_critic_reference(x2, params)
    assert out2.shape == (300, output_dim)
    assert bool(jnp.allclose(out2, ref2, atol=1e-3, rtol=1e-3)), "case2 mismatch"

    # Case 3: unaligned small batch (20 rows), single block.
    key, kx3 = jax.random.split(key)
    x3 = jax.random.normal(kx3, (20, input_dim), jnp.float32)
    out3 = jax.block_until_ready(mlp_critic_forward(x3, params))
    ref3 = mlp_critic_reference(x3, params)
    assert out3.shape == (20, output_dim)
    assert bool(jnp.allclose(out3, ref3, atol=1e-3, rtol=1e-3)), "case3 mismatch"

    print("KERNEL_OK")
</pallas_src>

<mosaic_0001>
module attributes {stable_mosaic.version = 11 : i64} {
  func.func @kernel(%arg0: i32, %arg1: memref<8x16xf32, #tpu.memory_space<vmem>>, %arg2: memref<32x16xf32, #tpu.memory_space<vmem>>, %arg3: memref<32x1xf32, #tpu.memory_space<vmem>>, %arg4: memref<32x32xf32, #tpu.memory_space<vmem>>, %arg5: memref<32x1xf32, #tpu.memory_space<vmem>>, %arg6: memref<1x32xf32, #tpu.memory_space<vmem>>, %arg7: memref<1x1xf32, #tpu.memory_space<vmem>>, %arg8: memref<1x8xf32, #tpu.memory_space<vmem>>) attributes {dimension_semantics = [#tpu.dimension_semantics<parallel>], iteration_bounds = array<i64: 1>, scalar_prefetch = 0 : i64, scratch_operands = 0 : i64, tpu.core_type = #tpu.core_type<tc>, window_params = [{transform_indices = @transform_0, window_bounds = array<i64: 8, 16>}, {pipeline_mode = #tpu.pipeline_mode<synchronous>, transform_indices = @transform_1, window_bounds = array<i64: 32, 16>}, {pipeline_mode = #tpu.pipeline_mode<synchronous>, transform_indices = @transform_2, window_bounds = array<i64: 32, 1>}, {pipeline_mode = #tpu.pipeline_mode<synchronous>, transform_indices = @transform_3, window_bounds = array<i64: 32, 32>}, {pipeline_mode = #tpu.pipeline_mode<synchronous>, transform_indices = @transform_4, window_bounds = array<i64: 32, 1>}, {pipeline_mode = #tpu.pipeline_mode<synchronous>, transform_indices = @transform_5, window_bounds = array<i64: 1, 32>}, {pipeline_mode = #tpu.pipeline_mode<synchronous>, transform_indices = @transform_6, window_bounds = array<i64: 1, 1>}, {transform_indices = @transform_7, window_bounds = array<i64: 1, 8>}]} {
    %c0 = arith.constant 0 : index
    %c0_0 = arith.constant 0 : index
    %0 = vector.load %arg1[%c0, %c0_0] : memref<8x16xf32, #tpu.memory_space<vmem>>, vector<8x16xf32>
    %c0_1 = arith.constant 0 : index
    %c0_2 = arith.constant 0 : index
    %1 = vector.load %arg2[%c0_1, %c0_2] : memref<32x16xf32, #tpu.memory_space<vmem>>, vector<32x16xf32>
    %c0_3 = arith.constant 0 : index
    %c0_4 = arith.constant 0 : index
    %2 = vector.load %arg3[%c0_3, %c0_4] : memref<32x1xf32, #tpu.memory_space<vmem>>, vector<32x1xf32>
    %cst = arith.constant dense<0.000000e+00> : vector<32x8xf32>
    %3 = tpu.matmul %1, %0, %cst {dimension_numbers = #tpu.dot_dimension_numbers<[1], [1], [0], [0], [0, 0, 1, 0], [], []>} : vector<32x16xf32>, vector<8x16xf32>, vector<32x8xf32> -> vector<32x8xf32>
    %4 = vector.broadcast %2 : vector<32x1xf32> to vector<32x8xf32>
    %5 = arith.addf %3, %4 : vector<32x8xf32>
    %6 = math.tanh %5 : vector<32x8xf32>
    %c0_5 = arith.constant 0 : index
    %c0_6 = arith.constant 0 : index
    %7 = vector.load %arg4[%c0_5, %c0_6] : memref<32x32xf32, #tpu.memory_space<vmem>>, vector<32x32xf32>
    %c0_7 = arith.constant 0 : index
    %c0_8 = arith.constant 0 : index
    %8 = vector.load %arg5[%c0_7, %c0_8] : memref<32x1xf32, #tpu.memory_space<vmem>>, vector<32x1xf32>
    %cst_9 = arith.constant dense<0.000000e+00> : vector<32x8xf32>
    %9 = tpu.matmul %7, %6, %cst_9 {dimension_numbers = #tpu.dot_dimension_numbers<[1], [0], [0], [1], [0, 0, 1, 1], [], []>} : vector<32x32xf32>, vector<32x8xf32>, vector<32x8xf32> -> vector<32x8xf32>
    %10 = vector.broadcast %8 : vector<32x1xf32> to vector<32x8xf32>
    %11 = arith.addf %9, %10 : vector<32x8xf32>
    %12 = math.tanh %11 : vector<32x8xf32>
    %c0_10 = arith.constant 0 : index
    %c0_11 = arith.constant 0 : index
    %13 = vector.load %arg6[%c0_10, %c0_11] : memref<1x32xf32, #tpu.memory_space<vmem>>, vector<1x32xf32>
    %c0_12 = arith.constant 0 : index
    %c0_13 = arith.constant 0 : index
    %14 = vector.load %arg7[%c0_12, %c0_13] : memref<1x1xf32, #tpu.memory_space<vmem>>, vector<1x1xf32>
    %cst_14 = arith.constant dense<0.000000e+00> : vector<1x8xf32>
    %15 = tpu.matmul %13, %12, %cst_14 {dimension_numbers = #tpu.dot_dimension_numbers<[1], [0], [0], [1], [0, 0, 1, 1], [], []>} : vector<1x32xf32>, vector<32x8xf32>, vector<1x8xf32> -> vector<1x8xf32>
    %16 = vector.broadcast %14 : vector<1x1xf32> to vector<1x8xf32>
    %17 = arith.addf %15, %16 : vector<1x8xf32>
    %c0_15 = arith.constant 0 : index
    %c0_16 = arith.constant 0 : index
    %18 = vector.load %arg8[%c0_15, %c0_16] : memref<1x8xf32, #tpu.memory_space<vmem>>, vector<1x8xf32>
    tpu.vector_store %arg8[%c0_15, %c0_16], %17 {strides = array<i32>} : memref<1x8xf32, #tpu.memory_space<vmem>>, vector<1x8xf32>,
    return
  }
  func.func @transform_0(%arg0: i32) -> (i32, i32) {
    %c0_i32 = arith.constant 0 : i32
    %c0_i32_0 = arith.constant 0 : i32
    return %arg0, %c0_i32 : i32, i32
  }
  func.func @transform_1(%arg0: i32) -> (i32, i32) {
    %c0_i32 = arith.constant 0 : i32
    %c0_i32_0 = arith.constant 0 : i32
    %c0_i32_1 = arith.constant 0 : i32
    return %c0_i32, %c0_i32_0 : i32, i32
  }
  func.func @transform_2(%arg0: i32) -> (i32, i32) {
    %c0_i32 = arith.constant 0 : i32
    %c0_i32_0 = arith.constant 0 : i32
    %c0_i32_1 = arith.constant 0 : i32
    return %c0_i32, %c0_i32_0 : i32, i32
  }
  func.func @transform_3(%arg0: i32) -> (i32, i32) {
    %c0_i32 = arith.constant 0 : i32
    %c0_i32_0 = arith.constant 0 : i32
    %c0_i32_1 = arith.constant 0 : i32
    return %c0_i32, %c0_i32_0 : i32, i32
  }
  func.func @transform_4(%arg0: i32) -> (i32, i32) {
    %c0_i32 = arith.constant 0 : i32
    %c0_i32_0 = arith.constant 0 : i32
    %c0_i32_1 = arith.constant 0 : i32
    return %c0_i32, %c0_i32_0 : i32, i32
  }
  func.func @transform_5(%arg0: i32) -> (i32, i32) {
    %c0_i32 = arith.constant 0 : i32
    %c0_i32_0 = arith.constant 0 : i32
    %c0_i32_1 = arith.constant 0 : i32
    return %c0_i32, %c0_i32_0 : i32, i32
  }
  func.func @transform_6(%arg0: i32) -> (i32, i32) {
    %c0_i32 = arith.constant 0 : i32
    %c0_i32_0 = arith.constant 0 : i32
    %c0_i32_1 = arith.constant 0 : i32
    return %c0_i32, %c0_i32_0 : i32, i32
  }
  func.func @transform_7(%arg0: i32) -> (i32, i32) {
    %c0_i32 = arith.constant 0 : i32
    %c0_i32_0 = arith.constant 0 : i32
    return %c0_i32, %arg0 : i32, i32
  }
}

</mosaic_0001>

<bundles_post_ra>
// kernel: mlp_critic_forward.1
= control target key start
LH: loop header
LB: loop body
LE: loop exit
PB: predicated region body
PF: predicated region fallthrough
CT: control target
= control target key end

     0   :  { %s640_s0 = inlined_call_operand.vmem [shape: f32[8,16], index: 0, kind: input, shape index: {}]   ;;  %s641_s1 = inlined_call_operand.vmem [shape: f32[32,16], index: 1, kind: input, shape index: {}]   ;;  %s642_s2 = inlined_call_operand.vmem [shape: f32[32,1], index: 2, kind: input, shape index: {}]   ;;  %s643_s3 = inlined_call_operand.vmem [shape: f32[32,32], index: 3, kind: input, shape index: {}]   ;;  %s644_s4 = inlined_call_operand.vmem [shape: f32[32,1], index: 4, kind: input, shape index: {}]   ;;  %s645_s5 = inlined_call_operand.vmem [shape: f32[1,32], index: 5, kind: input, shape index: {}]   ;;  %s646_s6 = inlined_call_operand.<no memory space> [shape: f32[1,1], index: 6, kind: input, shape index: {}]   ;;  %s647_s7 = inlined_call_operand.hbm [shape: f32[1,8], index: 7, kind: output, shape index: {}]  }
   0x1   :  { %v12_v0 = vstv %s646_s6 }
   0x2   :  { %13 = vst [vmem:[#allocation2] sm:$0x1] %v12_v0 }
   0x3   :  { %v29_v1 = vld [vmem:[%s640_s0] sm:$0xff]  ;;  %vm58_vm0 = vcmask 130048   ;;  %v31_v4 = vld [vmem:[%s641_s1 + $0x8] sm:$0xff]  ;;  %v515_v5 = vmov 0   ;;  %v36_v6 = vld [vmem:[%s642_s2 + $0x10] sm:$0xff] }
   0x4   :  { %v30_v2 = vld [vmem:[%s641_s1] sm:$0xff]  ;;  %421 = vmatprep.subr.msk.mxu0 %vm58_vm0, %v29_v1  ;;  %473 = vset.pattern.permute.xlu0 %v515_v5  ;;  %v32_v7 = vld [vmem:[%s641_s1 + $0x10] sm:$0xff]  ;;  %v35_v8 = vld [vmem:[%s642_s2 + $0x8] sm:$0xff] }
   0x5   :  { %423 = vmatprep.mubr.msk.f32.mxu0 %vm58_vm0, %v30_v2  ;;  %v34_v3 = vld [vmem:[%s642_s2] sm:$0xff]  ;;  %422 = vmatpush3.xpose.msk.msra.mxu0 %vm58_vm0, %v29_v1 }
   0x6   :  { %40 = vperm.xlu0 %473, %v34_v3   ;;  %474 = vset.pattern.permute.xlu1 %v515_v5 }
   0x7   :  { %50 = vperm.xlu1 %474, %v36_v6  }
   0x8   :  { %14 = vsyncpa [#allocation4], 0  ;;  %424 = vmatmul.mubr.msk.f32.vlgmr.msra.gmra.mrb[0].mxu0 %vm58_vm0, %v31_v4  ;;  %v37_v9 = vld [vmem:[%s642_s2 + $0x18] sm:$0xff]  ;;  %v167_v11 = vld [vmem:[%s644_s4] sm:$0xff]  ;;  %vm191_vm1 = vcmask 261120   ;;  %v516_v38 = vmov 0.0|0.0   ;;  %v300_v59 = vlaneseq }
   0x9   :  { %426 = vmatprep.mubr.msk.f32.mxu0 %vm58_vm0, %v32_v7  ;;  %v33_v10 = vld [vmem:[%s641_s1 + $0x18] sm:$0xff]  ;;  %v168_v12 = vld [vmem:[%s644_s4 + $0x8] sm:$0xff]  ;;  %v169_v13 = vld [vmem:[%s644_s4 + $0x10] sm:$0xff]  ;;  %462 = vmatprep.subr.bf16.mxu0 %v516_v38  ;;  %vm517_vm2 = vmmov 0   ;;  %v518_v39 = vmov 0.0   ;;  %s519_s9 = smov [#allocation3]  }
   0xa   :  { %45 = vperm.xlu0 %473, %v35_v8   ;;  %v170_v14 = vld [vmem:[%s644_s4 + $0x18] sm:$0xff]  ;;  %v294_v15 = vld [vmem:[#allocation2] sm:$0x1]  ;;  %v164_v35 = vld [vmem:[%s643_s3 + $0x8] sm:$0xff]  ;;  %v301_v60 = vshrl.u32 %v300_v59, 7  ;;  %s385_s0 = sshll.u32 %s519_s9, 4  ;;  %s386_s0 = int_to_ptr.vmem [resolvable:$true] %s385_s0 }
   0xb   :  { %55 = vperm.xlu1 %474, %v37_v9   ;;  %v163_v16 = vld [vmem:[%s643_s3] sm:$0xff]  ;;  %v165_v36 = vld [vmem:[%s643_s3 + $0x10] sm:$0xff]  ;;  %v166_v37 = vld [vmem:[%s643_s3 + $0x18] sm:$0xff]  ;;  %vm377_vm3 = vcmask 57344   ;;  %s491_s10 = scalar_lea.vmem %s386_s0, 16  ;;  %s495_s11 = scalar_lea.vmem %s386_s0, 32 }
   0xc   :  { %427 = vmatmul.mubr.msk.f32.gmra.mrb[2].mxu0 %vm58_vm0, %v33_v10  ;;  %437 = vmatprep.mubr.msk.f32.mxu1 %vm191_vm1, %v163_v16  ;;  %v293_v58 = vld [vmem:[%s645_s5] sm:$0x1]  ;;  %v302_v61 = vsub.s32 0, %v301_v60  ;;  %p492_p0 = scmp.ne.s32.totalorder %s386_s0, %s491_s10  ;;  %p496_p1 = scmp.lt.s32.totalorder %s386_s0, %s386_s0 }
   0xd   :  { %451 = vmatprep.mubr.msk.f32.mxu0 %vm517_vm2, %v518_v39  ;;  %p497_p2 = scmp.lt.s32.totalorder %s495_s11, %s491_s10 }
   0xe   :  { %173 = vperm.xlu0 %473, %v167_v11  }
   0xf   :  { %178 = vperm.xlu1 %474, %v168_v12   ;;  %p498_p3 = por %p497_p2, %p496_p1 }
  0x11   :  { %p499_p4 = pnand %p498_p3, %p492_p0 }
  0x12   :  { %183 = vperm.xlu0 %473, %v169_v13  }
  0x13   :  { %188 = vperm.xlu1 %474, %v170_v14  }
  0x16   :  { %297 = vperm.xlu0 %473, %v294_v15  }
  0x85   :  { %v41_v17 = vpop.permute.xlu0 %40 }
  0x86   :  { %v51_v18 = vpop.permute.xlu1 %50 }
  0x89   :  { %v46_v19 = vpop.permute.xlu0 %45 }
  0x8a   :  { %v56_v24 = vpop.permute.xlu1 %55 }
  0x8d   :  { %v174_v41 = vpop.permute.xlu0 %173 }
  0x8e   :  { %v179_v40 = vpop.permute.xlu1 %178 }
  0x91   :  { %v184_v48 = vpop.permute.xlu0 %183 }
  0x92   :  { %v189_v46 = vpop.permute.xlu1 %188 }
  0x95   :  { %v298_v62 = vpop.permute.xlu0 %297 }
  0x96   :  { %v303_v63 = vrot.slane %v298_v62, %v302_v61 }
  0xdb   :  { %v425_v20 = vpop.f32.mrb[0].mxu0 }
  0xdc   :  { %v146_v21 = vadd.f32 %v425_v20, %v46_v19  ;;  %v140_v22 = vpop.f32.mrb[1].mxu0 }
  0xdd   :  { %v141_v23 = vadd.f32 %v140_v22, %v41_v17 }
  0xde   :  { %475 = vtanh.f32 %v146_v21 }
  0xdf   :  { %477 = vtanh.f32 %v141_v23  ;;  %v428_v25 = vpop.f32.mrb[2].mxu0 }
  0xe0   :  { %v156_v26 = vadd.f32 %v428_v25, %v56_v24  ;;  %v150_v27 = vpop.f32.mrb[3].mxu0 }
  0xe1   :  { %v151_v28 = vadd.f32 %v150_v27, %v51_v18 }
  0xe2   :  { %479 = vtanh.f32 %v156_v26 }
  0xe3   :  { %481 = vtanh.f32 %v151_v28 }
  0xe8   :  { %v476_v29 = vpop.eup %475 }
  0xe9   :  { %v478_v30 = vpop.eup %477 }
  0xea   :  { %v454_v31 = vpack.c.bf16 %v476_v29, %v478_v30 }
  0xec   :  { %v480_v32 = vpop.eup %479  ;;  %455 = vmatprep.subr.bf16.mxu1 %v454_v31 }
  0xed   :  { %v482_v33 = vpop.eup %481  ;;  %457 = vmatpush3.bf16.msra.mxu1 %v454_v31 }
  0xee   :  { %v458_v34 = vpack.c.bf16 %v480_v32, %v482_v33 }
  0xf0   :  { %459 = vmatprep.subr.bf16.mxu1 %v458_v34 }
  0xf1   :  { %461 = vmatpush3.bf16.msra.mxu1 %v458_v34 }
  0xf4   :  { %438 = vmatmul.mubr.msk.f32.vlgmr.msra.gmra.mrb[0].mxu1 %vm191_vm1, %v164_v35 }
  0xf5   :  { %440 = vmatprep.mubr.msk.f32.mxu1 %vm191_vm1, %v165_v36 }
  0xf8   :  { %441 = vmatmul.mubr.msk.f32.gmra.mrb[2].mxu1 %vm191_vm1, %v166_v37 }
 0x1c7   :  { %v439_v42 = vpop.f32.mrb[0].mxu1 }
 0x1c8   :  { %v276_v43 = vadd.f32 %v439_v42, %v179_v40  ;;  %v270_v44 = vpop.f32.mrb[1].mxu1 }
 0x1c9   :  { %v271_v45 = vadd.f32 %v270_v44, %v174_v41 }
 0x1ca   :  { %483 = vtanh.f32 %v276_v43 }
 0x1cb   :  { %485 = vtanh.f32 %v271_v45  ;;  %v442_v47 = vpop.f32.mrb[2].mxu1 }
 0x1cc   :  { %v286_v49 = vadd.f32 %v442_v47, %v189_v46  ;;  %v280_v50 = vpop.f32.mrb[3].mxu1 }
 0x1cd   :  { %v281_v51 = vadd.f32 %v280_v50, %v184_v48 }
 0x1ce   :  { %487 = vtanh.f32 %v286_v49 }
 0x1cf   :  { %489 = vtanh.f32 %v281_v51 }
 0x1d4   :  { %v484_v52 = vpop.eup %483 }
 0x1d5   :  { %v486_v53 = vpop.eup %485 }
 0x1d6   :  { %v463_v54 = vpack.c.bf16 %v484_v52, %v486_v53 }
 0x1d8   :  { %v488_v55 = vpop.eup %487  ;;  %464 = vmatpush3.bf16.msra.mxu0 %v463_v54 }
 0x1d9   :  { %v490_v56 = vpop.eup %489  ;;  %465 = vmatprep.subr.bf16.mxu0 %v516_v38 }
 0x1da   :  { %v466_v57 = vpack.c.bf16 %v488_v55, %v490_v56 }
 0x1dc   :  { %467 = vmatpush3.bf16.msra.mxu0 %v466_v57 }
 0x1df   :  { %452 = vmatmul.mubr.msk.f32.vlgmr.msra.gmra.mrb[4].mxu0 %vm191_vm1, %v293_v58 }
 0x2b2   :  { %v373_v0 = vpop.f32.mrb[4].mxu0 }
 0x2b3   :  { %v374_v1 = vadd.f32 %v373_v0, %v303_v63  ;;  %v453_v2 = vpop.f32.mrb[5].mxu0 }
 0x2b5   :  { %378 = vst.msk [vmem:[#allocation3] sm:$0x1] %vm377_vm3, %v374_v1 }
 0x2b6   :  { %502 = shalt.err (!%p499_p4)
}
 0x2b7   :  { %s503_s13 = scalar_lea.hbm %s647_s7, 16 }
 0x2b8   :  { %p504_p5 = scmp.ne.s32.totalorder %s647_s7, %s503_s13  ;;  %p507_p6 = scmp.lt.u32.totalorder %s503_s13, %s647_s7 }
 0x2ba   :  { %p509_p7 = pnand %p507_p6, %p504_p5 }
 0x2bc   :  { %512 = shalt.err (!%p509_p7)
}
 0x2bd   :  { %388 = dma.vmem_to_hbm [thread:$0]  %s386_s0, 16, %s647_s7, [#allocation4]  }
 0x2be   :  { %513 = dma.done.wait [#allocation4], 16  }
 0x2bf   :  { %514 = vsyncadd [#allocation4], 4294967280 }
 0x2c0   :  { %392 = vsyncpa [#allocation4], 1 }

</bundles_post_ra>
